<compile_context>
chip_gen: v5e
topology: v5e:2x2
jax: 0.10.0
libtpu: 0.0.40
codegen_flags: <defaults>
</compile_context>

<pallas_src>
import functools

import jax
import jax.numpy as jnp
from jax.experimental import pallas as pl
from jax.experimental.pallas import tpu as pltpu

_MIB = 1024 * 1024


def _round_up(x, m):
    return ((x + m - 1) // m) * m


# ----------------------------- kernel bodies ------------------------------ #

def _gemm_kernel_single(x_ref, w_ref, o_ref, *, precision):
    # K fits in a single tile: one MXU pass, no accumulator, no pl.when.
    o_ref[...] = jnp.dot(
        x_ref[...], w_ref[...],
        precision=precision, preferred_element_type=jnp.float32,
    ).astype(o_ref.dtype)


def _gemm_kernel_accum_inplace(x_ref, w_ref, o_ref, *, precision):
    # f32 output block is resident across the K grid axis: accumulate into it
    # directly and skip the scratch buffer entirely.
    @pl.when(pl.program_id(2) == 0)
    def _():
        o_ref[...] = jnp.zeros_like(o_ref)

    o_ref[...] += jnp.dot(
        x_ref[...], w_ref[...],
        precision=precision, preferred_element_type=jnp.float32,
    )


def _gemm_kernel_scratch(x_ref, w_ref, o_ref, acc_ref, *, precision):
    # Generic path (non-f32 output, K tiled): f32 accumulator scratch.
    @pl.when(pl.program_id(2) == 0)
    def _():
        acc_ref[...] = jnp.zeros_like(acc_ref)

    acc_ref[...] += jnp.dot(
        x_ref[...], w_ref[...],
        precision=precision, preferred_element_type=jnp.float32,
    )

    @pl.when(pl.program_id(2) == pl.num_programs(2) - 1)
    def _():
        o_ref[...] = acc_ref[...].astype(o_ref.dtype)


# ----------------------------- tiling policy ------------------------------ #

def _vmem_budget_bytes():
    """Per-generation VMEM budget (physical capacity minus ~25% headroom for
    compiler-internal scratch and pipeline buffers)."""
    try:
        cap = int(pltpu.get_tpu_info().vmem_capacity_bytes)
    except Exception:
        cap = 64 * _MIB          # conservative: v7x per-TensorCore VMEM
    return (cap * 3) // 4


def _pick_tiles(M, K, N, in_itemsize, vmem_budget):
    """Output tiles large enough to be compute-bound (arithmetic intensity
    ~tm*tn/(tm+tn)), tk kept modest since it buys no intensity, only VMEM."""
    if in_itemsize <= 2:                       # bf16 / fp8 operands
        if vmem_budget >= 80 * _MIB:           # v5e / v6e (128 MiB physical)
            tm_d, tn_d = 1024, 1024
        else:                                  # v7x (64 MiB per TensorCore)
            tm_d, tn_d = 768, 768
        tk_d = 512
    else:                                      # f32 operands
        tm_d, tn_d, tk_d = 512, 512, 512
    # Clamp to the full dim when the array is smaller than the default tile:
    # a block equal to the full dim is always legal (even if not a multiple
    # of 8 / 128), so small K or N never force padding.
    tm = tm_d if M > tm_d else M
    tn = tn_d if N > tn_d else N
    tk = tk_d if K > tk_d else K
    return tm, tn, tk


# ------------------------------- entry point ------------------------------ #

def simple_gemm(x, w, *, tm=None, tn=None, tk=None, precision=None,
                cast_inputs_to_bf16=False):
    M, K = x.shape
    K2, N = w.shape
    assert K == K2, "inner dims must match"

    out_dtype = x.dtype

    # Optional: bf16 inputs with f32 accumulation (3-6x MXU throughput and
    # half the HBM traffic on v6e/v7x when the model tolerates it).
    if cast_inputs_to_bf16:
        if x.dtype == jnp.float32:
            x = x.astype(jnp.bfloat16)
        if w.dtype == jnp.float32:
            w = w.astype(jnp.bfloat16)

    bx = jnp.dtype(x.dtype).itemsize
    bw = jnp.dtype(w.dtype).itemsize
    bo = jnp.dtype(out_dtype).itemsize

    budget = _vmem_budget_bytes()

    auto = tm is None and tn is None and tk is None
    if auto:
        tm, tn, tk = _pick_tiles(M, K, N, max(bx, bw), budget)
        # Megacore (v7x has 2 TCs sharded over the parallel grid axes): if
        # both parallel axes collapse to one block, split N so both cores work.
        if M <= tm and N <= tn and N >= 256:
            tn = _round_up((N + 1) // 2, 128)
    else:
        assert tm is not None and tn is not None and tk is not None, \
            "pass all of tm/tn/tk or none of them"
        tm, tn, tk = min(tm, M), min(tn, N), min(tk, K)
        assert tm == M or tm % 8 == 0, f"tm={tm}: multiple of 8 or == M"
        assert tn == N or tn % 128 == 0, f"tn={tn}: multiple of 128 or == N"
        assert tk == K or tk % 128 == 0, f"tk={tk}: multiple of 128 or == K"

    # Only the contraction dim needs zero padding for correctness; garbage in
    # ragged M/N edge tiles only lands in discarded output rows/cols.
    Kp = _round_up(K, tk)
    if Kp != K:
        x = jnp.pad(x, ((0, 0), (0, Kp - K)))
        w = jnp.pad(w, ((0, Kp - K), (0, 0)))

    grid = (pl.cdiv(M, tm), pl.cdiv(N, tn), Kp // tk)
    grid_m, grid_n, grid_k = grid

    if grid_k == 1:
        kernel = functools.partial(_gemm_kernel_single, precision=precision)
        scratch_shapes = []
        acc_bytes = 0
    elif out_dtype == jnp.float32:
        kernel = functools.partial(_gemm_kernel_accum_inplace,
                                   precision=precision)
        scratch_shapes = []
        acc_bytes = 0
    else:
        kernel = functools.partial(_gemm_kernel_scratch, precision=precision)
        scratch_shapes = [pltpu.VMEM((tm, tn), jnp.float32)]
        acc_bytes = tm * tn * 4

    # Double-buffered input tiles + double-buffered output tile + optional acc.
    footprint = (2 * tm * tk * bx + 2 * tk * tn * bw
                 + 2 * tm * tn * bo + acc_bytes)
    if footprint > budget:
        raise ValueError(
            f"tile footprint {footprint / _MIB:.1f} MiB exceeds the VMEM "
            f"budget {budget / _MIB:.1f} MiB on this TPU generation; "
            "use smaller tm/tn/tk")
    vmem_limit = int(min(max(2 * footprint, 32 * _MIB), budget))

    # Truthful HBM traffic: x is re-streamed once per N-block, w once per
    # M-block, output written once.
    cost = pl.CostEstimate(
        flops=2 * M * N * K,
        transcendentals=0,
        bytes_accessed=grid_n * M * K * bx + grid_m * K * N * bw + M * N * bo,
    )

    # NOTE: for tiny problems (e.g. the 8x32 demo) a plain jnp.dot beats the
    # fixed pallas_call + DMA overhead; we keep the Pallas path so the kernel
    # is always exercised.  If profiling shows exposed DMA on the K stream,
    # pipeline_mode=pl.Buffered(3) on the input BlockSpecs is cheap insurance.
    out = pl.pallas_call(
        kernel,
        out_shape=jax.ShapeDtypeStruct((M, N), out_dtype),
        grid_spec=pltpu.PrefetchScalarGridSpec(
            num_scalar_prefetch=0,
            grid=grid,
            in_specs=[
                pl.BlockSpec((tm, tk), lambda i, j, k: (i, k)),
                pl.BlockSpec((tk, tn), lambda i, j, k: (k, j)),
            ],
            out_specs=pl.BlockSpec((tm, tn), lambda i, j, k: (i, j)),
            scratch_shapes=scratch_shapes,
        ),
        compiler_params=pltpu.CompilerParams(
            dimension_semantics=("parallel", "parallel", "arbitrary"),
            vmem_limit_bytes=vmem_limit,
        ),
        cost_estimate=cost,
    )(x, w)
    return out


class SimpleGemm:
    """JAX/Pallas port of the PyTorch module: forward(x) = x @ w."""

    def __init__(self, width, key):
        # torch.rand(width, width) -> uniform [0, 1)
        self.w = jax.random.uniform(key, (width, width), dtype=jnp.float32)
        # w is static; at width=32 no K padding is needed (full-array blocks),
        # so nothing to pre-pad here.  For large ragged K, pre-pad once here.

    def __call__(self, x):
        return simple_gemm(x, self.w)


if __name__ == "__main__":
    # Small shapes consistent with the module: x is (seq, width), w is square.
    width = 32
    seq = 8

    key = jax.random.PRNGKey(0)
    k_w, k_x = jax.random.split(key)

    model = SimpleGemm(width, k_w)
    x = jax.random.uniform(k_x, (seq, width), dtype=jnp.float32)

    out = jax.block_until_ready(model(x))
    assert out.shape == (seq, width)

    # Reference in full f32; kernel uses the TPU's default (bf16-pass) matmul
    # precision, so use a bf16-aware tolerance.
    ref = jnp.dot(x, model.w, precision=jax.lax.Precision.HIGHEST)
    assert jnp.allclose(out, ref, rtol=2e-2, atol=1e-2), \
        float(jnp.max(jnp.abs(out - ref)))

    # Exercise the tiled / K-streamed path (ragged M edge tiles, padded K,
    # in-place f32 accumulation across the K grid axis) with explicit tiles.
    k_xb, k_wb = jax.random.split(jax.random.PRNGKey(1))
    xb = jax.random.uniform(k_xb, (300, 640), dtype=jnp.float32)
    wb = jax.random.uniform(k_wb, (640, 384), dtype=jnp.float32)
    outb = jax.block_until_ready(simple_gemm(xb, wb, tm=128, tn=128, tk=256))
    refb = jnp.dot(xb, wb, precision=jax.lax.Precision.HIGHEST)
    assert outb.shape == (300, 384)
    assert jnp.allclose(outb, refb, rtol=2e-2, atol=1e-2), \
        float(jnp.max(jnp.abs(outb - refb)))

    print("KERNEL_OK")
</pallas_src>

<mosaic_0001>
module attributes {stable_mosaic.version = 11 : i64} {
  func.func @_gemm_kernel_single(%arg0: i32, %arg1: i32, %arg2: i32, %arg3: memref<8x32xf32, #tpu.memory_space<vmem>>, %arg4: memref<32x32xf32, #tpu.memory_space<vmem>>, %arg5: memref<8x32xf32, #tpu.memory_space<vmem>>) attributes {dimension_semantics = [#tpu.dimension_semantics<parallel>, #tpu.dimension_semantics<parallel>, #tpu.dimension_semantics<arbitrary>], iteration_bounds = array<i64: 1, 1, 1>, scalar_prefetch = 0 : i64, scratch_operands = 0 : i64, tpu.core_type = #tpu.core_type<tc>, window_params = [{transform_indices = @transform_0, window_bounds = array<i64: 8, 32>}, {transform_indices = @transform_1, window_bounds = array<i64: 32, 32>}, {transform_indices = @transform_2, window_bounds = array<i64: 8, 32>}]} {
    %c0 = arith.constant 0 : index
    %c0_0 = arith.constant 0 : index
    %0 = vector.load %arg3[%c0, %c0_0] : memref<8x32xf32, #tpu.memory_space<vmem>>, vector<8x32xf32>
    %c0_1 = arith.constant 0 : index
    %c0_2 = arith.constant 0 : index
    %1 = vector.load %arg4[%c0_1, %c0_2] : memref<32x32xf32, #tpu.memory_space<vmem>>, vector<32x32xf32>
    %cst = arith.constant dense<0.000000e+00> : vector<8x32xf32>
    %2 = tpu.matmul %0, %1, %cst {dimension_numbers = #tpu.dot_dimension_numbers<[1], [0], [0], [1], [0, 0, 1, 1], [], []>} : vector<8x32xf32>, vector<32x32xf32>, vector<8x32xf32> -> vector<8x32xf32>
    %c0_3 = arith.constant 0 : index
    %c0_4 = arith.constant 0 : index
    %3 = vector.load %arg5[%c0_3, %c0_4] : memref<8x32xf32, #tpu.memory_space<vmem>>, vector<8x32xf32>
    tpu.vector_store %arg5[%c0_3, %c0_4], %2 {strides = array<i32>} : memref<8x32xf32, #tpu.memory_space<vmem>>, vector<8x32xf32>,
    return
  }
  func.func @transform_0(%arg0: i32, %arg1: i32, %arg2: i32) -> (i32, i32) {
    %c0_i32 = arith.constant 0 : i32
    return %arg0, %arg2 : i32, i32
  }
  func.func @transform_1(%arg0: i32, %arg1: i32, %arg2: i32) -> (i32, i32) {
    %c0_i32 = arith.constant 0 : i32
    return %arg2, %arg1 : i32, i32
  }
  func.func @transform_2(%arg0: i32, %arg1: i32, %arg2: i32) -> (i32, i32) {
    %c0_i32 = arith.constant 0 : i32
    return %arg0, %arg1 : i32, i32
  }
}

</mosaic_0001>

<bundles_post_ra>
// kernel: tpu_custom_call.1
= control target key start
LH: loop header
LB: loop body
LE: loop exit
PB: predicated region body
PF: predicated region fallthrough
CT: control target
= control target key end

     0   :  { %7 = vsyncpa [#allocation3], 0  ;;  %s203_s0 = inlined_call_operand.hbm [shape: f32[8,32], index: 0, kind: input, shape index: {}]   ;;  %s204_s1 = inlined_call_operand.hbm [shape: f32[32,32], index: 1, kind: input, shape index: {}]   ;;  %s205_s2 = inlined_call_operand.hbm [shape: f32[8,32], index: 2, kind: output, shape index: {}]  }
   0x1   :  { %8 = vsyncpa [#allocation6], 0 }
   0x2   :  { %9 = vsyncpa [#allocation4], 0  ;;  %s15_s11 = sshll.u32 %s203_s0, 4  ;;  %s174_s12 = smov [#allocation2]   ;;  %s16_s11 = int_to_ptr.hbm [resolvable:$true] %s15_s11 }
   0x3   :  { %s17_s13 = sshll.u32 %s174_s12, 4  ;;  %s25_s16 = sshll.u32 %s204_s1, 4  ;;  %s18_s13 = int_to_ptr.vmem [resolvable:$true] %s17_s13  ;;  %s26_s16 = int_to_ptr.hbm [resolvable:$true] %s25_s16 }
   0x4   :  { %20 = dma.hbm_to_vmem [thread:$0]  %s16_s11, 128, %s18_s13, [#allocation3]  }
   0x5   :  { %s175_s17 = smov [#allocation5]   ;;  %s176_s19 = smov 128  }
   0x6   :  { %s27_s18 = sshll.u32 %s175_s17, 4  ;;  %s177_s20 = smov 8   ;;  %s28_s18 = int_to_ptr.vmem [resolvable:$true] %s27_s18 }
   0x7   :  { %33 = dma.hbm_to_vmem [thread:$0]  %s26_s16, 512, %s28_s18, [#allocation6], %s176_s19, %s176_s19, %s177_s20  }
   0x8   :  { %168 = dma.done.wait [#allocation3], 128  }
   0x9   :  { %169 = vsyncadd [#allocation3], 4294967168 }
   0xa   :  { %170 = dma.done.wait [#allocation6], 512  }
   0xb   :  { %171 = vsyncadd [#allocation6], 4294966784  ;;  %v46_v0 = vld [vmem:[#allocation5 + $0x18] sm:$0xff]  ;;  %v45_v1 = vld [vmem:[#allocation5 + $0x10] sm:$0xff]  ;;  %vm47_vm0 = vcmask 261120   ;;  %s178_s0 = smov [#allocation7]  }
   0xc   :  { %63 = vmatpush.msra.mxu0 %v46_v0  ;;  %v44_v2 = vld [vmem:[#allocation5 + $0x8] sm:$0xff]  ;;  %v43_v3 = vld [vmem:[#allocation5] sm:$0xff]  ;;  %v42_v4 = vld [vmem:[#allocation2] sm:$0xff]  ;;  %s77_s1 = sshll.u32 %s178_s0, 4  ;;  %s79_s23 = sshll.u32 %s205_s2, 4  ;;  %s78_s1 = int_to_ptr.vmem [resolvable:$true] %s77_s1  ;;  %s80_s23 = int_to_ptr.hbm [resolvable:$true] %s79_s23 }
   0xe   :  { %64 = vmatpush.msra.mxu0 %v45_v1 }
  0x10   :  { %65 = vmatpush.msra.mxu0 %v44_v2 }
  0x12   :  { %66 = vmatpush.msra.mxu0 %v43_v3 }
  0x13   :  { %90 = vmatmul.msk.f32.vlgmr.msra.gmra.mxu0 %vm47_vm0, %v42_v4 }
  0x90   :  { %v68_v5 = vpop.f32.mrf.mxu0 }
  0x91   :  { %71 = vst.msk [vmem:[#allocation7] sm:$0xff] %vm47_vm0, %v68_v5 }
  0x92   :  { %82 = dma.vmem_to_hbm [thread:$0]  %s78_s1, 128, %s80_s23, [#allocation4]  }
  0x93   :  { %172 = dma.done.wait [#allocation4], 128  }
  0x94   :  { %173 = vsyncadd [#allocation4], 4294967168 }
  0x95   :  { %87 = vsyncpa [#allocation3], 1 }
  0x96   :  { %88 = vsyncpa [#allocation6], 1 }
  0x97   :  { %89 = vsyncpa [#allocation4], 1 }

</bundles_post_ra>
